<compile_context>
chip_gen: v6e
topology: v6e:2x2x1
jax: 0.10.0
libtpu: 0.0.40
codegen_flags: <defaults>
</compile_context>

<pallas_src>
import functools
import math

import jax
import jax.numpy as jnp
from jax import lax
from jax.experimental import pallas as pl
from jax.experimental.pallas import tpu as pltpu


# --------------------------- tiled linear kernel ---------------------------

def linear_kernel(x_ref, w_ref, b_ref, o_ref, acc_ref):
    # x: (tm, tk), w: (tk, tn), b: (1, tn) -> o: (tm, tn); f32 accumulator.
    k = pl.program_id(2)

    @pl.when(k == 0)
    def _():
        acc_ref[...] = jnp.zeros_like(acc_ref)

    acc_ref[...] += jnp.dot(x_ref[...], w_ref[...],
                            preferred_element_type=jnp.float32)

    @pl.when(k == pl.num_programs(2) - 1)
    def _():
        o_ref[...] = (acc_ref[...] + b_ref[...].astype(jnp.float32)
                      ).astype(o_ref.dtype)


def _pick_tile(dim, cap, align):
    """Largest tile <= cap that divides dim and respects alignment, else full dim."""
    if dim <= cap:
        return dim
    t = (cap // align) * align
    while t >= align:
        if dim % t == 0:
            return t
        t -= align
    return dim  # fall back to an untiled (full) axis


def linear(x, w, b, *, tm_cap=256, tn_cap=256, tk_cap=512):
    """x: (N, d_in), w: (d_in, d_out)  [stored pre-transposed], b: (d_out,)."""
    n, d_in = x.shape
    d_out = w.shape[1]
    tm = _pick_tile(n, tm_cap, 8)
    tn = _pick_tile(d_out, tn_cap, 128)
    tk = _pick_tile(d_in, tk_cap, 128)
    grid = (n // tm, d_out // tn, d_in // tk)
    b2 = b.reshape(1, d_out)
    return pl.pallas_call(
        linear_kernel,
        out_shape=jax.ShapeDtypeStruct((n, d_out), x.dtype),
        grid_spec=pltpu.PrefetchScalarGridSpec(
            num_scalar_prefetch=0,
            grid=grid,
            in_specs=[
                pl.BlockSpec((tm, tk), lambda i, j, k: (i, k)),
                pl.BlockSpec((tk, tn), lambda i, j, k: (k, j)),
                pl.BlockSpec((1, tn), lambda i, j, k: (0, j)),
            ],
            out_specs=pl.BlockSpec((tm, tn), lambda i, j, k: (i, j)),
            scratch_shapes=[pltpu.VMEM((tm, tn), jnp.float32)],
        ),
        compiler_params=pltpu.CompilerParams(
            dimension_semantics=("parallel", "parallel", "arbitrary")),
    )(x, w, b2)


# ------------------- fused Q-proj + attention + out-proj -------------------

def fused_attn_kernel(x_ref, k_ref, v_ref, wq_ref, bq_ref, wo_ref, bo_ref,
                      o_ref, *, n_heads, d_keys, scale):
    # x_ref : (1, L, d_model)       target embedding for this batch element
    # k_ref : (S, H*E)              projected keys   (VMEM-resident across grid)
    # v_ref : (S, H*E)              projected values (VMEM-resident across grid)
    # wq_ref: (d_model, H*E), bq_ref: (1, H*E)
    # wo_ref: (H*E, d_llm),   bo_ref: (1, d_llm)
    # o_ref : (1, L, d_llm)
    H, E = n_heads, d_keys
    x = x_ref[0]                                        # (L, d_model)
    L = x.shape[0]

    # Q projection (f32 accumulation on the MXU).
    q = jnp.dot(x, wq_ref[...], preferred_element_type=jnp.float32) \
        + bq_ref[...].astype(jnp.float32)               # (L, H*E)

    k = k_ref[...]
    v = v_ref[...]
    wo = wo_ref[...]
    d_llm = wo.shape[1]

    # Output accumulator, lane-dense over d_llm; start from the output bias.
    acc = jnp.broadcast_to(bo_ref[...].astype(jnp.float32), (L, d_llm))

    # Per-head attention; heads are fused into a single grid step so the
    # per-step overhead is paid once per batch element, and the output
    # projection is accumulated head-by-head:
    #   out = concat_h(attn_h) @ Wo + bo = sum_h attn_h @ Wo[hE:(h+1)E, :] + bo
    for h in range(H):
        sl = slice(h * E, (h + 1) * E)
        qh = q[:, sl]                                   # (L, E) f32
        kh = k[:, sl].astype(jnp.float32)               # (S, E)
        vh = v[:, sl]                                   # (S, E)

        # scores = qh @ kh^T without materializing a transpose of K.
        s = lax.dot_general(qh, kh, (((1,), (1,)), ((), ())),
                            preferred_element_type=jnp.float32) * scale  # (L,S)
        s = s - jnp.max(s, axis=-1, keepdims=True)
        p = jnp.exp(s)
        p = p * pl.reciprocal(jnp.sum(p, axis=-1, keepdims=True), approx=True)

        oh = jnp.dot(p.astype(vh.dtype), vh,
                     preferred_element_type=jnp.float32)                 # (L,E)
        acc = acc + jnp.dot(oh, wo[sl, :].astype(jnp.float32),
                            preferred_element_type=jnp.float32)          # (L,d_llm)

    o_ref[0] = acc.astype(o_ref.dtype)


def fused_attention(x, k_proj, v_proj, q_params, o_params, n_heads, d_keys):
    """x: (B, L, d_model); k_proj/v_proj: (S, H*E) -> (B, L, d_llm)."""
    B, L, d_model = x.shape
    S, d_hid = k_proj.shape
    wq, bq = q_params
    wo, bo = o_params
    d_llm = wo.shape[1]
    scale = 1.0 / math.sqrt(d_keys)

    kernel = functools.partial(fused_attn_kernel, n_heads=n_heads,
                               d_keys=d_keys, scale=scale)
    return pl.pallas_call(
        kernel,
        out_shape=jax.ShapeDtypeStruct((B, L, d_llm), x.dtype),
        grid_spec=pltpu.PrefetchScalarGridSpec(
            num_scalar_prefetch=0,
            grid=(B,),
            in_specs=[
                pl.BlockSpec((1, L, d_model), lambda b: (b, 0, 0)),
                pl.BlockSpec((S, d_hid), lambda b: (0, 0)),   # resident K
                pl.BlockSpec((S, d_hid), lambda b: (0, 0)),   # resident V
                pl.BlockSpec((d_model, d_hid), lambda b: (0, 0)),
                pl.BlockSpec((1, d_hid), lambda b: (0, 0)),
                pl.BlockSpec((d_hid, d_llm), lambda b: (0, 0)),
                pl.BlockSpec((1, d_llm), lambda b: (0, 0)),
            ],
            out_specs=pl.BlockSpec((1, L, d_llm), lambda b: (b, 0, 0)),
        ),
        compiler_params=pltpu.CompilerParams(
            dimension_semantics=("parallel",)),   # batch shards across TCs (v7x)
    )(x, k_proj, v_proj, wq, bq.reshape(1, d_hid), wo, bo.reshape(1, d_llm))


# ----------------------------- Module wrapper ------------------------------

def init_params(key, d_model, n_heads, d_llm, d_keys=None, dtype=jnp.float32):
    d_keys = d_keys or d_model // n_heads
    d_hid = d_keys * n_heads
    keys = jax.random.split(key, 8)

    def lin(kw, kb, d_in, d_out):
        bound = 1.0 / math.sqrt(d_in)
        # Stored pre-transposed as (d_in, d_out) — same init distribution as
        # PyTorch's (d_out, d_in) layout, but kernels consume it directly
        # with no transpose op / extra HBM traffic.
        w = jax.random.uniform(kw, (d_in, d_out), dtype, -bound, bound)
        b = jax.random.uniform(kb, (d_out,), dtype, -bound, bound)
        return w, b

    params = {
        "q": lin(keys[0], keys[1], d_model, d_hid),
        "k": lin(keys[2], keys[3], d_llm, d_hid),
        "v": lin(keys[4], keys[5], d_llm, d_hid),
        "o": lin(keys[6], keys[7], d_hid, d_llm),
    }
    return params, d_keys


def reprogramming_layer(params, target_embedding, source_embedding,
                        value_embedding, n_heads, d_keys):
    # Batch-independent K / V projections (tiled Pallas matmuls).
    k_proj = linear(source_embedding, *params["k"])     # (S, H*E)
    v_proj = linear(value_embedding, *params["v"])      # (S, H*E)

    # Fused per-batch kernel: Q projection + multi-head cross attention
    # + output projection, written directly in (B, L, d_llm).
    return fused_attention(target_embedding, k_proj, v_proj,
                           params["q"], params["o"], n_heads, d_keys)


# --------------------------- Pure-JAX reference ----------------------------

def reference(params, target_embedding, source_embedding, value_embedding,
              n_heads, d_keys):
    B, L, d_model = target_embedding.shape
    S, d_llm = source_embedding.shape
    H, E = n_heads, d_keys

    def lin(x, wb):
        w, b = wb               # w stored as (d_in, d_out)
        return x @ w + b

    q = lin(target_embedding, params["q"]).reshape(B, L, H, E)
    k = lin(source_embedding, params["k"]).reshape(S, H, E)
    v = lin(value_embedding, params["v"]).reshape(S, H, E)
    scores = jnp.einsum("blhe,she->bhls", q, k)
    attn = jax.nn.softmax(scores / math.sqrt(E), axis=-1)
    out = jnp.einsum("bhls,she->blhe", attn, v).reshape(B, L, H * E)
    return lin(out, params["o"])


# ---------------------------------- main -----------------------------------

if __name__ == "__main__":
    B, L, S = 2, 8, 16
    d_model, n_heads, d_llm = 32, 4, 64

    key = jax.random.PRNGKey(0)
    kp, kt, ks, kv = jax.random.split(key, 4)

    params, d_keys = init_params(kp, d_model, n_heads, d_llm)

    target_embedding = jax.random.normal(kt, (B, L, d_model), jnp.float32)
    source_embedding = jax.random.normal(ks, (S, d_llm), jnp.float32)
    value_embedding = jax.random.normal(kv, (S, d_llm), jnp.float32)

    out = reprogramming_layer(params, target_embedding, source_embedding,
                              value_embedding, n_heads, d_keys)
    out = jax.block_until_ready(out)

    ref = reference(params, target_embedding, source_embedding,
                    value_embedding, n_heads, d_keys)

    assert out.shape == (B, L, d_llm), out.shape
    # Tolerance accounts for the EUP approximate reciprocal (approx=True) in
    # the softmax denominator and f32 MXU accumulation-order differences.
    assert jnp.allclose(out, ref, atol=2e-3, rtol=2e-3), \
        float(jnp.max(jnp.abs(out - ref)))

    print("KERNEL_OK")
</pallas_src>

<mosaic_0001>
module attributes {stable_mosaic.version = 11 : i64} {
  func.func @linear_kernel(%arg0: i32, %arg1: i32, %arg2: i32, %arg3: memref<16x64xf32, #tpu.memory_space<vmem>>, %arg4: memref<64x32xf32, #tpu.memory_space<vmem>>, %arg5: memref<1x32xf32, #tpu.memory_space<vmem>>, %arg6: memref<16x32xf32, #tpu.memory_space<vmem>>, %arg7: memref<16x32xf32, #tpu.memory_space<vmem>>) attributes {dimension_semantics = [#tpu.dimension_semantics<parallel>, #tpu.dimension_semantics<parallel>, #tpu.dimension_semantics<arbitrary>], iteration_bounds = array<i64: 1, 1, 1>, scalar_prefetch = 0 : i64, scratch_operands = 1 : i64, tpu.core_type = #tpu.core_type<tc>, window_params = [{transform_indices = @transform_0, window_bounds = array<i64: 16, 64>}, {transform_indices = @transform_1, window_bounds = array<i64: 64, 32>}, {transform_indices = @transform_2, window_bounds = array<i64: 1, 32>}, {transform_indices = @transform_3, window_bounds = array<i64: 16, 32>}]} {
    %c0_i32 = arith.constant 0 : i32
    %0 = arith.cmpi eq, %arg2, %c0_i32 : i32
    %1 = arith.extui %0 : i1 to i32
    %c0_i32_0 = arith.constant 0 : i32
    %2 = arith.cmpi ne, %1, %c0_i32_0 : i32
    scf.if %2 {
      %cst_10 = arith.constant 0.000000e+00 : f32
      %12 = vector.broadcast %cst_10 : f32 to vector<16x32xf32>
      %c0_11 = arith.constant 0 : index
      %c0_12 = arith.constant 0 : index
      %13 = vector.load %arg7[%c0_11, %c0_12] : memref<16x32xf32, #tpu.memory_space<vmem>>, vector<16x32xf32>
      tpu.vector_store %arg7[%c0_11, %c0_12], %12 {strides = array<i32>} : memref<16x32xf32, #tpu.memory_space<vmem>>, vector<16x32xf32>,
    } else {
    }
    %c0 = arith.constant 0 : index
    %c0_1 = arith.constant 0 : index
    %3 = vector.load %arg7[%c0, %c0_1] : memref<16x32xf32, #tpu.memory_space<vmem>>, vector<16x32xf32>
    %c0_2 = arith.constant 0 : index
    %c0_3 = arith.constant 0 : index
    %4 = vector.load %arg3[%c0_2, %c0_3] : memref<16x64xf32, #tpu.memory_space<vmem>>, vector<16x64xf32>
    %c0_4 = arith.constant 0 : index
    %c0_5 = arith.constant 0 : index
    %5 = vector.load %arg4[%c0_4, %c0_5] : memref<64x32xf32, #tpu.memory_space<vmem>>, vector<64x32xf32>
    %cst = arith.constant dense<0.000000e+00> : vector<16x32xf32>
    %6 = tpu.matmul %4, %5, %cst {dimension_numbers = #tpu.dot_dimension_numbers<[1], [0], [0], [1], [0, 0, 1, 1], [], []>} : vector<16x64xf32>, vector<64x32xf32>, vector<16x32xf32> -> vector<16x32xf32>
    %7 = arith.addf %3, %6 : vector<16x32xf32>
    %c0_6 = arith.constant 0 : index
    %c0_7 = arith.constant 0 : index
    %8 = vector.load %arg7[%c0_6, %c0_7] : memref<16x32xf32, #tpu.memory_space<vmem>>, vector<16x32xf32>
    tpu.vector_store %arg7[%c0_6, %c0_7], %7 {strides = array<i32>} : memref<16x32xf32, #tpu.memory_space<vmem>>, vector<16x32xf32>,
    %c0_i32_8 = arith.constant 0 : i32
    %9 = arith.cmpi eq, %arg2, %c0_i32_8 : i32
    %10 = arith.extui %9 : i1 to i32
    %c0_i32_9 = arith.constant 0 : i32
    %11 = arith.cmpi ne, %10, %c0_i32_9 : i32
    scf.if %11 {
      %c0_10 = arith.constant 0 : index
      %c0_11 = arith.constant 0 : index
      %12 = vector.load %arg7[%c0_10, %c0_11] : memref<16x32xf32, #tpu.memory_space<vmem>>, vector<16x32xf32>
      %c0_12 = arith.constant 0 : index
      %c0_13 = arith.constant 0 : index
      %13 = vector.load %arg5[%c0_12, %c0_13] : memref<1x32xf32, #tpu.memory_space<vmem>>, vector<1x32xf32>
      %14 = vector.broadcast %13 : vector<1x32xf32> to vector<16x32xf32>
      %15 = arith.addf %12, %14 : vector<16x32xf32>
      %c0_14 = arith.constant 0 : index
      %c0_15 = arith.constant 0 : index
      %16 = vector.load %arg6[%c0_14, %c0_15] : memref<16x32xf32, #tpu.memory_space<vmem>>, vector<16x32xf32>
      tpu.vector_store %arg6[%c0_14, %c0_15], %15 {strides = array<i32>} : memref<16x32xf32, #tpu.memory_space<vmem>>, vector<16x32xf32>,
    } else {
    }
    return
  }
  func.func @transform_0(%arg0: i32, %arg1: i32, %arg2: i32) -> (i32, i32) {
    %c0_i32 = arith.constant 0 : i32
    return %arg0, %arg2 : i32, i32
  }
  func.func @transform_1(%arg0: i32, %arg1: i32, %arg2: i32) -> (i32, i32) {
    %c0_i32 = arith.constant 0 : i32
    return %arg2, %arg1 : i32, i32
  }
  func.func @transform_2(%arg0: i32, %arg1: i32, %arg2: i32) -> (i32, i32) {
    %c0_i32 = arith.constant 0 : i32
    %c0_i32_0 = arith.constant 0 : i32
    return %c0_i32, %arg1 : i32, i32
  }
  func.func @transform_3(%arg0: i32, %arg1: i32, %arg2: i32) -> (i32, i32) {
    %c0_i32 = arith.constant 0 : i32
    return %arg0, %arg1 : i32, i32
  }
}

</mosaic_0001>

<bundles_post_ra>
// kernel: tpu_custom_call.1
= control target key start
LH: loop header
LB: loop body
LE: loop exit
PB: predicated region body
PF: predicated region fallthrough
CT: control target
= control target key end

     0   :  { %vm34_vm0 = vcmask 523264   ;;  %vm19_vm1 = vcmask 261120   ;;  %v211_v2 = vmov 0.0   ;;  %s279_s0 = inlined_call_operand.vmem [shape: f32[16,64], index: 0, kind: input, shape index: {}]   ;;  %s280_s1 = inlined_call_operand.vmem [shape: f32[64,32], index: 1, kind: input, shape index: {}]   ;;  %s281_s2 = inlined_call_operand.vmem [shape: f32[1,32], index: 2, kind: input, shape index: {}]   ;;  %s282_s3 = inlined_call_operand.hbm [shape: f32[16,32], index: 3, kind: output, shape index: {}]  }
   0x1   :  { %v33_v0 = vld [vmem:[%s280_s1 + $0x38] sm:$0xff]  ;;  %v32_v1 = vld [vmem:[%s280_s1 + $0x30] sm:$0xff]  ;;  %21 = vst.msk [vmem:[#allocation2 + $0x8] sm:$0xff] %vm19_vm1, %v211_v2  ;;  %20 = vst.msk [vmem:[#allocation2] sm:$0xff] %vm19_vm1, %v211_v2 }
   0x2   :  { %166 = vmatprep.subr.mxu0 %v33_v0  ;;  %v31_v3 = vld [vmem:[%s280_s1 + $0x28] sm:$0xff]  ;;  %v24_v4 = vld [vmem:[%s279_s0] sm:$0xff] }
   0x3   :  { %167 = vmatpush3.msra.mxu0 %v33_v0  ;;  %182 = vmatprep.mubr.msk.f32.mxu0 %vm34_vm0, %v24_v4 }
   0x4   :  { %168 = vmatprep.subr.mxu0 %v32_v1 }
   0x5   :  { %8 = vsyncpa [#allocation4], 0  ;;  %169 = vmatpush3.msra.mxu0 %v32_v1  ;;  %v30_v5 = vld [vmem:[%s280_s1 + $0x20] sm:$0xff]  ;;  %v29_v6 = vld [vmem:[%s280_s1 + $0x18] sm:$0xff]  ;;  %s212_s6 = smov [#allocation3]  }
   0x6   :  { %170 = vmatprep.subr.mxu0 %v31_v3  ;;  %v28_v7 = vld [vmem:[%s280_s1 + $0x10] sm:$0xff]  ;;  %v27_v8 = vld [vmem:[%s280_s1 + $0x8] sm:$0xff]  ;;  %v26_v9 = vld [vmem:[%s280_s1] sm:$0xff] }
   0x7   :  { %171 = vmatpush3.msra.mxu0 %v31_v3  ;;  %v25_v10 = vld [vmem:[%s279_s0 + $0x8] sm:$0xff]  ;;  %v155_v17 = vld [vmem:[%s281_s2] ss:$0 sm:$0xff]  ;;  %s142_s0 = sshll.u32 %s212_s6, 4  ;;  %s143_s0 = int_to_ptr.vmem [resolvable:$true] %s142_s0 }
   0x8   :  { %172 = vmatprep.subr.mxu0 %v30_v5  ;;  %v23_v11 = vld [vmem:[#allocation2 + $0x8] sm:$0xff]  ;;  %v22_v13 = vld [vmem:[#allocation2] sm:$0xff]  ;;  %s189_s7 = scalar_lea.vmem %s143_s0, 256  ;;  %p194_p1 = scmp.lt.s32.totalorder %s143_s0, %s143_s0 }
   0x9   :  { %173 = vmatpush3.msra.mxu0 %v30_v5  ;;  %p190_p0 = scmp.ne.s32.totalorder %s143_s0, %s189_s7  ;;  %p195_p2 = scmp.lt.s32.totalorder %s189_s7, %s189_s7 }
   0xa   :  { %174 = vmatprep.subr.mxu0 %v29_v6 }
   0xb   :  { %175 = vmatpush3.msra.mxu0 %v29_v6  ;;  %p196_p3 = por %p195_p2, %p194_p1 }
   0xc   :  { %176 = vmatprep.subr.mxu0 %v28_v7 }
   0xd   :  { %177 = vmatpush3.msra.mxu0 %v28_v7  ;;  %p197_p4 = pnand %p196_p3, %p190_p0 }
   0xe   :  { %178 = vmatprep.subr.mxu0 %v27_v8 }
   0xf   :  { %179 = vmatpush3.msra.mxu0 %v27_v8 }
  0x10   :  { %180 = vmatprep.subr.mxu0 %v26_v9 }
  0x11   :  { %181 = vmatpush3.msra.mxu0 %v26_v9 }
  0x12   :  { %183 = vmatmul.mubr.msk.f32.vlgmr.msra.gmra.mxu0 %vm34_vm0, %v25_v10 }
  0xd2   :  { %v184_v12 = vpop.f32.mrf.mxu0 }
  0xd3   :  { %v117_v14 = vadd.f32 %v184_v12, %v23_v11 }
  0xd4   :  { %v107_v15 = vpop.f32.mrf.mxu0 }
  0xd5   :  { %120 = vst.msk [vmem:[#allocation2 + $0x8] sm:$0xff] %vm19_vm1, %v117_v14  ;;  %v116_v16 = vadd.f32 %v107_v15, %v22_v13 }
  0xd7   :  { %119 = vst.msk [vmem:[#allocation2] sm:$0xff] %vm19_vm1, %v116_v16 }
  0xdc   :  { %v125_v18 = vld [vmem:[#allocation2 + $0x8] sm:$0xff] }
  0xdd   :  { %v134_v19 = vadd.f32 %v155_v17, %v125_v18 }
  0xde   :  { %v124_v20 = vld [vmem:[#allocation2] sm:$0xff] }
  0xdf   :  { %v133_v21 = vadd.f32 %v155_v17, %v124_v20  ;;  %136 = vst.msk [vmem:[#allocation3 + $0x8] sm:$0xff] %vm19_vm1, %v134_v19 }
  0xe1   :  { %135 = vst.msk [vmem:[#allocation3] sm:$0xff] %vm19_vm1, %v133_v21 }
  0xe2   :  { %200 = shalt.err (!%p197_p4)
}
  0xe3   :  { %s213_s8 = smov 128   ;;  %s214_s2 = smov 8  }
  0xe4   :  { %148 = dma.vmem_to_hbm [thread:$0]  %s143_s0, 256, %s282_s3, [#allocation4], %s213_s8, %s213_s8, %s214_s2  }
  0xe5   :  { %209 = dma.done.wait [#allocation4], 256  }
  0xe6   :  { %210 = vsyncadd [#allocation4], 4294967040 }
  0xe7   :  { %152 = vsyncpa [#allocation4], 1 }

</bundles_post_ra>
